<compile_context>
chip_gen: v6e
topology: v6e:2x2x1
jax: 0.10.0
libtpu: 0.0.40
codegen_flags: <defaults>
</compile_context>

<pallas_src>
import functools

import jax
import jax.numpy as jnp
from jax.experimental import pallas as pl
from jax.experimental.pallas import tpu as pltpu

STATE_DIM = 47
ACTION_DIM = 10
HIDDEN = 128            # critic_net
K_PAD = 64              # state+action (57) zero-padded to a lane-friendly 64


def _round_up(a, m):
    return -(-a // m) * m


def critic_kernel(x_ref, u_ref, w1_ref, b1_ref, w2_ref, b2_ref, w3_ref,
                  b3_ref, o_ref):
    tb = x_ref.shape[0]
    mm_dtype = w1_ref.dtype   # bf16 (default) or f32 (exact fallback)

    # Layer 1: build concat([x, u]) in-kernel along lanes, zero-pad K to 64,
    # and run ONE MXU pass against the resident (64, 128) W1 (pad rows = 0).
    lhs = jnp.concatenate(
        [x_ref[...], u_ref[...],
         jnp.zeros((tb, K_PAD - STATE_DIM - ACTION_DIM), x_ref.dtype)],
        axis=-1).astype(mm_dtype)                                  # (TB, 64)
    h1 = jnp.dot(lhs, w1_ref[...], preferred_element_type=jnp.float32)
    h1 = jnp.maximum(h1 + b1_ref[...], 0.0)                        # (TB, 128) f32

    # Layer 2.
    h2 = jnp.dot(h1.astype(mm_dtype), w2_ref[...],
                 preferred_element_type=jnp.float32)
    h2 = jnp.maximum(h2 + b2_ref[...], 0.0)                        # (TB, 128) f32

    # Layer 3 (128 -> 1): VPU multiply + XLU lane reduce; keeps the MXU free.
    q = jnp.sum(h2 * w3_ref[...], axis=-1) + b3_ref[0]             # (TB,) f32

    # Lane-dense store: batch along lanes.
    # TODO(synk): verify in the bundle dump that the sublane->lane relayout of
    # q[None, :] stays hidden under the MXU-bound regime (review: low priority).
    o_ref[...] = q[None, :].astype(o_ref.dtype)                    # (1, TB)


def prepare_params(params, compute_dtype=jnp.bfloat16):
    """One-time, batch-independent weight prep (hoisted out of the forward).

    compute_dtype=jnp.bfloat16 runs the matmuls at bf16 MXU rate with f32
    accumulation; pass jnp.float32 for an exact-precision fallback.
    Weights are stored [in_features, out_features] (transposed vs torch).
    """
    w1, b1, w2, b2, w3, b3 = params
    w1p = jnp.zeros((K_PAD, HIDDEN), compute_dtype)
    w1p = w1p.at[:STATE_DIM + ACTION_DIM].set(w1.astype(compute_dtype))
    return (w1p,                                               # (64, 128)
            b1.reshape(1, HIDDEN).astype(jnp.float32),         # (1, 128)
            w2.astype(compute_dtype),                          # (128, 128)
            b2.reshape(1, HIDDEN).astype(jnp.float32),         # (1, 128)
            w3.reshape(1, HIDDEN).astype(jnp.float32),         # (1, 128)
            b3.reshape(1).astype(jnp.float32))                 # (1,)  -> SMEM


@functools.partial(jax.jit, static_argnames=("block_b",))
def critic_forward(x, u, prepared, block_b=512):
    """x: (B, 47) f32, u: (B, 10) f32, prepared = prepare_params(...) -> (B, 1)."""
    w1p, b1, w2b, b2, w3r, b3s = prepared
    B = x.shape[0]
    block_b = max(128, _round_up(block_b, 128))

    # TB maps to the MXU LHS push count (not MXU width): choose it to amortize
    # the ~600-cycle per-grid-step overhead (single-TC v5e/v6e) and to give
    # >=2 parallel steps on v7x (2 TCs) for mid-size batches.  Multi-step
    # tiles are multiples of 128 so the (1, TB) output blocks stay unmasked.
    if B <= 128:
        tb = B                                 # one full-array tile (any B legal)
    elif B <= 2 * block_b:
        tb = _round_up(-(-B // 2), 128)        # ~2 steps (megacore on v7x)
    else:
        tb = block_b
    grid = (pl.cdiv(B, tb),)                   # partial last block: Pallas-masked

    resident = lambda shape: pl.BlockSpec(shape, lambda i: (0, 0))

    out = pl.pallas_call(
        critic_kernel,
        out_shape=jax.ShapeDtypeStruct((1, B), jnp.float32),
        grid=grid,
        in_specs=[
            pl.BlockSpec((tb, STATE_DIM), lambda i: (i, 0)),    # x  (streamed)
            pl.BlockSpec((tb, ACTION_DIM), lambda i: (i, 0)),   # u  (streamed)
            resident((K_PAD, HIDDEN)),                          # W1 (resident)
            resident((1, HIDDEN)),                              # b1
            resident((HIDDEN, HIDDEN)),                         # W2 (resident)
            resident((1, HIDDEN)),                              # b2
            resident((1, HIDDEN)),                              # w3 row
            pl.BlockSpec(memory_space=pltpu.MemorySpace.SMEM),  # b3 scalar
        ],
        out_specs=pl.BlockSpec((1, tb), lambda i: (0, i)),      # lane-dense
        compiler_params=pltpu.CompilerParams(
            dimension_semantics=("parallel",),
            vmem_limit_bytes=32 * 1024 * 1024,
        ),
    )(x, u, w1p, b1, w2b, b2, w3r, b3s)

    return out.reshape(B, 1)


def init_params(key):
    """torch.nn.Linear-style init (U[-1/sqrt(fan_in), +1/sqrt(fan_in)]).
    Weights stored as [in_features, out_features] (transposed vs torch)."""
    def linear(k, fan_in, fan_out):
        kw, kb = jax.random.split(k)
        bound = 1.0 / jnp.sqrt(fan_in)
        w = jax.random.uniform(kw, (fan_in, fan_out), jnp.float32, -bound, bound)
        b = jax.random.uniform(kb, (1, fan_out), jnp.float32, -bound, bound)
        return w, b

    k1, k2, k3 = jax.random.split(key, 3)
    w1, b1 = linear(k1, STATE_DIM + ACTION_DIM, HIDDEN)
    w2, b2 = linear(k2, HIDDEN, HIDDEN)
    w3, b3 = linear(k3, HIDDEN, 1)
    return (w1, b1, w2, b2, w3, b3)


def critic_reference(x, u, params):
    """Pure f32 reference (exact module semantics)."""
    w1, b1, w2, b2, w3, b3 = params
    h = jnp.concatenate([x, u], axis=1)
    h = jnp.maximum(h @ w1 + b1, 0.0)
    h = jnp.maximum(h @ w2 + b2, 0.0)
    return h @ w3 + b3


def critic_reference_bf16(x, u, params):
    """Reference using the same bf16 matmul operands / f32 accumulation as the kernel."""
    w1, b1, w2, b2, w3, b3 = params
    f32 = jnp.float32
    h = jnp.concatenate([x, u], axis=1).astype(jnp.bfloat16)
    h = jnp.dot(h, w1.astype(jnp.bfloat16), preferred_element_type=f32) + b1
    h = jnp.maximum(h, 0.0)
    h = jnp.dot(h.astype(jnp.bfloat16), w2.astype(jnp.bfloat16),
                preferred_element_type=f32) + b2
    h = jnp.maximum(h, 0.0)
    return jnp.sum(h * w3.reshape(1, HIDDEN), axis=-1, keepdims=True) + b3


if __name__ == "__main__":
    key = jax.random.PRNGKey(0)
    kp, kx, ku, kx2, ku2 = jax.random.split(key, 5)

    params = init_params(kp)
    prepared = prepare_params(params)   # hoisted weight prep: done exactly once

    # Small batch: single full-array tile (B=8 -> TB=8, 1 grid step).
    B = 8
    x = jax.random.normal(kx, (B, STATE_DIM), jnp.float32)
    u = jax.random.normal(ku, (B, ACTION_DIM), jnp.float32)
    out = jax.block_until_ready(critic_forward(x, u, prepared))
    assert out.shape == (B, 1), out.shape
    assert jnp.allclose(out, critic_reference_bf16(x, u, params), atol=5e-3, rtol=5e-3)
    assert jnp.allclose(out, critic_reference(x, u, params), atol=3e-2, rtol=3e-2)

    # Larger, non-divisible batch: 2 grid steps (TB=256) with a partial last
    # block handled by Pallas boundary masking (no wrapper-side jnp.pad copies).
    B2 = 260
    x2 = jax.random.normal(kx2, (B2, STATE_DIM), jnp.float32)
    u2 = jax.random.normal(ku2, (B2, ACTION_DIM), jnp.float32)
    out2 = jax.block_until_ready(critic_forward(x2, u2, prepared))
    assert out2.shape == (B2, 1), out2.shape
    assert jnp.allclose(out2, critic_reference_bf16(x2, u2, params), atol=5e-3, rtol=5e-3)
    assert jnp.allclose(out2, critic_reference(x2, u2, params), atol=3e-2, rtol=3e-2)

    print("KERNEL_OK")
</pallas_src>

<mosaic_0001>
module attributes {stable_mosaic.version = 11 : i64} {
  func.func @critic_kernel(%arg0: i32, %arg1: memref<8x47xf32, #tpu.memory_space<vmem>>, %arg2: memref<8x10xf32, #tpu.memory_space<vmem>>, %arg3: memref<64x128xbf16, #tpu.memory_space<vmem>>, %arg4: memref<1x128xf32, #tpu.memory_space<vmem>>, %arg5: memref<128x128xbf16, #tpu.memory_space<vmem>>, %arg6: memref<1x128xf32, #tpu.memory_space<vmem>>, %arg7: memref<1x128xf32, #tpu.memory_space<vmem>>, %arg8: memref<1xf32, #tpu.memory_space<smem>>, %arg9: memref<1x8xf32, #tpu.memory_space<vmem>>) attributes {dimension_semantics = [#tpu.dimension_semantics<parallel>], iteration_bounds = array<i64: 1>, scalar_prefetch = 0 : i64, scratch_operands = 0 : i64, tpu.core_type = #tpu.core_type<tc>, window_params = [{transform_indices = @transform_0, window_bounds = array<i64: 8, 47>}, {transform_indices = @transform_1, window_bounds = array<i64: 8, 10>}, {pipeline_mode = #tpu.pipeline_mode<synchronous>, transform_indices = @transform_2, window_bounds = array<i64: 64, 128>}, {pipeline_mode = #tpu.pipeline_mode<synchronous>, transform_indices = @transform_3, window_bounds = array<i64: 1, 128>}, {pipeline_mode = #tpu.pipeline_mode<synchronous>, transform_indices = @transform_4, window_bounds = array<i64: 128, 128>}, {pipeline_mode = #tpu.pipeline_mode<synchronous>, transform_indices = @transform_5, window_bounds = array<i64: 1, 128>}, {pipeline_mode = #tpu.pipeline_mode<synchronous>, transform_indices = @transform_6, window_bounds = array<i64: 1, 128>}, {transform_indices = @transform_7, window_bounds = array<i64: 1>}, {transform_indices = @transform_8, window_bounds = array<i64: 1, 8>}]} {
    %c0 = arith.constant 0 : index
    %c0_0 = arith.constant 0 : index
    %0 = vector.load %arg1[%c0, %c0_0] : memref<8x47xf32, #tpu.memory_space<vmem>>, vector<8x47xf32>
    %c0_1 = arith.constant 0 : index
    %c0_2 = arith.constant 0 : index
    %1 = vector.load %arg2[%c0_1, %c0_2] : memref<8x10xf32, #tpu.memory_space<vmem>>, vector<8x10xf32>
    %cst = arith.constant 0.000000e+00 : f32
    %2 = vector.broadcast %cst : f32 to vector<8x7xf32>
    %3 = tpu.concatenate %0, %1, %2 in 1 : vector<8x47xf32>, vector<8x10xf32>, vector<8x7xf32> -> vector<8x64xf32>
    %4 = arith.truncf %3 : vector<8x64xf32> to vector<8x64xbf16>
    %c0_3 = arith.constant 0 : index
    %c0_4 = arith.constant 0 : index
    %5 = vector.load %arg3[%c0_3, %c0_4] : memref<64x128xbf16, #tpu.memory_space<vmem>>, vector<64x128xbf16>
    %cst_5 = arith.constant dense<0.000000e+00> : vector<8x128xf32>
    %6 = tpu.matmul %4, %5, %cst_5 {dimension_numbers = #tpu.dot_dimension_numbers<[1], [0], [0], [1], [0, 0, 1, 1], [], []>} : vector<8x64xbf16>, vector<64x128xbf16>, vector<8x128xf32> -> vector<8x128xf32>
    %c0_6 = arith.constant 0 : index
    %c0_7 = arith.constant 0 : index
    %7 = vector.load %arg4[%c0_6, %c0_7] : memref<1x128xf32, #tpu.memory_space<vmem>>, vector<1x128xf32>
    %8 = vector.broadcast %7 : vector<1x128xf32> to vector<8x128xf32>
    %9 = arith.addf %6, %8 : vector<8x128xf32>
    %cst_8 = arith.constant 0.000000e+00 : f32
    %10 = vector.broadcast %cst_8 : f32 to vector<8x128xf32>
    %11 = arith.maximumf %9, %10 : vector<8x128xf32>
    %12 = arith.truncf %11 : vector<8x128xf32> to vector<8x128xbf16>
    %c0_9 = arith.constant 0 : index
    %c0_10 = arith.constant 0 : index
    %13 = vector.load %arg5[%c0_9, %c0_10] : memref<128x128xbf16, #tpu.memory_space<vmem>>, vector<128x128xbf16>
    %cst_11 = arith.constant dense<0.000000e+00> : vector<8x128xf32>
    %14 = tpu.matmul %12, %13, %cst_11 {dimension_numbers = #tpu.dot_dimension_numbers<[1], [0], [0], [1], [0, 0, 1, 1], [], []>} : vector<8x128xbf16>, vector<128x128xbf16>, vector<8x128xf32> -> vector<8x128xf32>
    %c0_12 = arith.constant 0 : index
    %c0_13 = arith.constant 0 : index
    %15 = vector.load %arg6[%c0_12, %c0_13] : memref<1x128xf32, #tpu.memory_space<vmem>>, vector<1x128xf32>
    %16 = vector.broadcast %15 : vector<1x128xf32> to vector<8x128xf32>
    %17 = arith.addf %14, %16 : vector<8x128xf32>
    %cst_14 = arith.constant 0.000000e+00 : f32
    %18 = vector.broadcast %cst_14 : f32 to vector<8x128xf32>
    %19 = arith.maximumf %17, %18 : vector<8x128xf32>
    %c0_15 = arith.constant 0 : index
    %c0_16 = arith.constant 0 : index
    %20 = vector.load %arg7[%c0_15, %c0_16] : memref<1x128xf32, #tpu.memory_space<vmem>>, vector<1x128xf32>
    %21 = vector.broadcast %20 : vector<1x128xf32> to vector<8x128xf32>
    %22 = arith.mulf %19, %21 : vector<8x128xf32>
    %cst_17 = arith.constant dense<0.000000e+00> : vector<8xf32>
    %23 = vector.multi_reduction <add>, %22, %cst_17 [1] : vector<8x128xf32> to vector<8xf32>
    %c0_18 = arith.constant 0 : index
    %24 = memref.load %arg8[%c0_18] : memref<1xf32, #tpu.memory_space<smem>>
    %25 = vector.broadcast %24 : f32 to vector<8xf32>
    %26 = arith.addf %23, %25 : vector<8xf32>
    %27 = vector.shape_cast %26 : vector<8xf32> to vector<1x8xf32>
    %c0_19 = arith.constant 0 : index
    %c0_20 = arith.constant 0 : index
    %28 = vector.load %arg9[%c0_19, %c0_20] : memref<1x8xf32, #tpu.memory_space<vmem>>, vector<1x8xf32>
    tpu.vector_store %arg9[%c0_19, %c0_20], %27 {strides = array<i32>} : memref<1x8xf32, #tpu.memory_space<vmem>>, vector<1x8xf32>,
    return
  }
  func.func @transform_0(%arg0: i32) -> (i32, i32) {
    %c0_i32 = arith.constant 0 : i32
    %c0_i32_0 = arith.constant 0 : i32
    return %arg0, %c0_i32 : i32, i32
  }
  func.func @transform_1(%arg0: i32) -> (i32, i32) {
    %c0_i32 = arith.constant 0 : i32
    %c0_i32_0 = arith.constant 0 : i32
    return %arg0, %c0_i32 : i32, i32
  }
  func.func @transform_2(%arg0: i32) -> (i32, i32) {
    %c0_i32 = arith.constant 0 : i32
    %c0_i32_0 = arith.constant 0 : i32
    %c0_i32_1 = arith.constant 0 : i32
    return %c0_i32, %c0_i32_0 : i32, i32
  }
  func.func @transform_3(%arg0: i32) -> (i32, i32) {
    %c0_i32 = arith.constant 0 : i32
    %c0_i32_0 = arith.constant 0 : i32
    %c0_i32_1 = arith.constant 0 : i32
    return %c0_i32, %c0_i32_0 : i32, i32
  }
  func.func @transform_4(%arg0: i32) -> (i32, i32) {
    %c0_i32 = arith.constant 0 : i32
    %c0_i32_0 = arith.constant 0 : i32
    %c0_i32_1 = arith.constant 0 : i32
    return %c0_i32, %c0_i32_0 : i32, i32
  }
  func.func @transform_5(%arg0: i32) -> (i32, i32) {
    %c0_i32 = arith.constant 0 : i32
    %c0_i32_0 = arith.constant 0 : i32
    %c0_i32_1 = arith.constant 0 : i32
    return %c0_i32, %c0_i32_0 : i32, i32
  }
  func.func @transform_6(%arg0: i32) -> (i32, i32) {
    %c0_i32 = arith.constant 0 : i32
    %c0_i32_0 = arith.constant 0 : i32
    %c0_i32_1 = arith.constant 0 : i32
    return %c0_i32, %c0_i32_0 : i32, i32
  }
  func.func @transform_7(%arg0: i32) -> i32 {
    %c0_i32 = arith.constant 0 : i32
    %c0_i32_0 = arith.constant 0 : i32
    return %c0_i32 : i32
  }
  func.func @transform_8(%arg0: i32) -> (i32, i32) {
    %c0_i32 = arith.constant 0 : i32
    %c0_i32_0 = arith.constant 0 : i32
    return %c0_i32, %arg0 : i32, i32
  }
}

</mosaic_0001>

<bundles_post_ra>
// kernel: critic_forward.1
= control target key start
LH: loop header
LB: loop body
LE: loop exit
PB: predicated region body
PF: predicated region fallthrough
CT: control target
= control target key end

     0   :  { %14 = vsyncpa [#allocation4], 0  ;;  %s605_s0 = inlined_call_operand.hbm [shape: f32[8,47], index: 0, kind: input, shape index: {}]   ;;  %s606_s1 = inlined_call_operand.hbm [shape: f32[8,10], index: 1, kind: input, shape index: {}]   ;;  %s607_s2 = inlined_call_operand.hbm [shape: bf16[64,128], index: 2, kind: input, shape index: {}]   ;;  %s608_s3 = inlined_call_operand.vmem [shape: f32[1,128], index: 3, kind: input, shape index: {}]   ;;  %s609_s4 = inlined_call_operand.hbm [shape: bf16[128,128], index: 4, kind: input, shape index: {}]   ;;  %s610_s5 = inlined_call_operand.vmem [shape: f32[1,128], index: 5, kind: input, shape index: {}]   ;;  %s611_s6 = inlined_call_operand.vmem [shape: f32[1,128], index: 6, kind: input, shape index: {}]   ;;  %s612_s7 = inlined_call_operand.<no memory space> [shape: f32[1], index: 7, kind: input, shape index: {}]   ;;  %s613_s8 = inlined_call_operand.hbm [shape: f32[1,8], index: 8, kind: output, shape index: {}]  }
   0x1   :  { %15 = vsyncpa [#allocation7], 0 }
   0x2   :  { %16 = vsyncpa [#allocation10], 0 }
   0x3   :  { %17 = vsyncpa [#allocation5], 0  ;;  %s523_s27 = smov [#allocation6]   ;;  %s524_s29 = smov [#allocation3]  }
   0x4   :  { %s34_s28 = sshll.u32 %s523_s27, 4  ;;  %s24_s30 = sshll.u32 %s524_s29, 4  ;;  %s35_s28 = int_to_ptr.vmem [resolvable:$true] %s34_s28  ;;  %s25_s30 = int_to_ptr.vmem [resolvable:$true] %s24_s30 }
   0x5   :  { %s423_s9 = scalar_lea.vmem %s35_s28, 128  ;;  %p428_p1 = scmp.lt.s32.totalorder %s35_s28, %s35_s28 }
   0x6   :  { %p424_p0 = scmp.ne.s32.totalorder %s35_s28, %s423_s9  ;;  %p429_p2 = scmp.lt.s32.totalorder %s423_s9, %s423_s9 }
   0x8   :  { %p430_p3 = por %p429_p2, %p428_p1 }
   0xa   :  { %p431_p4 = pnand %p430_p3, %p424_p0 }
   0xc   :  { %434 = shalt.err (!%p431_p4)
}
   0xd   :  { %37 = dma.hbm_to_vmem [thread:$0]  %s606_s1, 128, %s35_s28, [#allocation7]  }
   0xe   :  { %s443_s12 = scalar_lea.vmem %s25_s30, 128  ;;  %p448_p6 = scmp.lt.s32.totalorder %s25_s30, %s25_s30 }
   0xf   :  { %p444_p5 = scmp.ne.s32.totalorder %s25_s30, %s443_s12  ;;  %p449_p7 = scmp.lt.s32.totalorder %s443_s12, %s443_s12 }
  0x11   :  { %p450_p8 = por %p449_p7, %p448_p6 }
  0x13   :  { %p451_p9 = pnand %p450_p8, %p444_p5 }
  0x15   :  { %454 = shalt.err (!%p451_p9)
}
  0x16   :  { %27 = dma.hbm_to_vmem [thread:$0]  %s605_s0, 128, %s25_s30, [#allocation4]  }
  0x17   :  { %s525_s15 = smov [#allocation8]  }
  0x18   :  { %s43_s16 = sshll.u32 %s525_s15, 4  ;;  %s44_s16 = int_to_ptr.vmem [resolvable:$true] %s43_s16 }
  0x19   :  { %s463_s17 = scalar_lea.vmem %s44_s16, 512  ;;  %p468_p11 = scmp.lt.s32.totalorder %s44_s16, %s44_s16 }
  0x1a   :  { %p464_p10 = scmp.ne.s32.totalorder %s44_s16, %s463_s17  ;;  %p469_p12 = scmp.lt.s32.totalorder %s463_s17, %s463_s17 }
  0x1c   :  { %p470_p13 = por %p469_p12, %p468_p11 }
  0x1e   :  { %p471_p0 = pnand %p470_p13, %p464_p10 }
  0x20   :  { %474 = shalt.err (!%p471_p0)
}
  0x21   :  { %s526_s1 = smov 64   ;;  %s527_s18 = smov 4  }
  0x22   :  { %49 = dma.hbm_to_vmem [thread:$0]  %s607_s2, 512, %s44_s16, [#allocation7], %s526_s1, %s526_s1, %s527_s18  }
  0x23   :  { %s528_s21 = smov [#allocation9]  }
  0x24   :  { %s57_s22 = sshll.u32 %s528_s21, 4  ;;  %s58_s22 = int_to_ptr.vmem [resolvable:$true] %s57_s22 }
  0x25   :  { %s483_s0 = scalar_lea.vmem %s58_s22, 1024  ;;  %p488_p2 = scmp.lt.s32.totalorder %s58_s22, %s58_s22 }
  0x26   :  { %p484_p1 = scmp.ne.s32.totalorder %s58_s22, %s483_s0  ;;  %p489_p3 = scmp.lt.s32.totalorder %s483_s0, %s483_s0 }
  0x28   :  { %p490_p4 = por %p489_p3, %p488_p2 }
  0x2a   :  { %p491_p5 = pnand %p490_p4, %p484_p1 }
  0x2c   :  { %494 = shalt.err (!%p491_p5)
}
  0x2d   :  { %63 = dma.hbm_to_vmem [thread:$0]  %s609_s4, 1024, %s58_s22, [#allocation10], %s526_s1, %s526_s1, %s527_s18  }
  0x2e   :  { %515 = dma.done.wait [#allocation4], 128  }
  0x2f   :  { %516 = vsyncadd [#allocation4], 4294967168 }
  0x30   :  { %517 = dma.done.wait [#allocation7], 640  }
  0x31   :  { %518 = vsyncadd [#allocation7], 4294966656 }
  0x32   :  { %519 = dma.done.wait [#allocation10], 1024  }
  0x33   :  { %520 = vsyncadd [#allocation10], 4294966272  ;;  %v529_v0 = vmov 0.0   ;;  %vm530_vm0 = vmmov 0   ;;  %v84_v1 = vld [vmem:[#allocation6] sm:$0xff]  ;;  %s531_s2 = smov 47   ;;  %v305_v36 = vlaneseq  ;;  %v302_v39 = vstv %s612_s7 }
  0x34   :  { %361 = vmatprep.subr.bf16.mxu0 %v529_v0  ;;  %373 = vmatprep.subr.bf16.mxu1 %v529_v0  ;;  %v403_v2 = vld [vmem:[#allocation8 + $0x18] sm:$0xff]   ;;  %v404_v3 = vld [vmem:[#allocation8 + $0x10] sm:$0xff]   ;;  %v405_v5 = vld [vmem:[#allocation8 + $0x8] sm:$0xff]   ;;  %vm89_vm1 = vcmask 384000   ;;  %vm91_vm2 = vcmask 465920   ;;  %vm133_vm3 = vcmask 523264  }
  0x35   :  { %369 = vmatprep.mubr.msk.bf16.mxu0 %vm530_vm0, %v529_v0  ;;  %389 = vmatprep.mubr.msk.bf16.mxu1 %vm530_vm0, %v529_v0  ;;  %v407_v4 = vld [vmem:[#allocation9 + $0x38] sm:$0xff]   ;;  %v408_v6 = vld [vmem:[#allocation9 + $0x30] sm:$0xff]   ;;  %v406_v7 = vld [vmem:[#allocation8] sm:$0xff]   ;;  %v306_v37 = vand.u32 127, %v305_v36  ;;  %v308_v38 = vshrl.u32 %v305_v36, 7  ;;  %vm312_vm4 = vcmask 57344  }
  0x36   :  { %86 = vrot.lane.b32.xlu0 %v84_v1, %s531_s2  ;;  %362 = vmatpush3.bf16.msra.mxu0 %v403_v2  ;;  %v409_v8 = vld [vmem:[#allocation9 + $0x28] sm:$0xff]   ;;  %v410_v9 = vld [vmem:[#allocation9 + $0x20] sm:$0xff]   ;;  %v411_v10 = vld [vmem:[#allocation9 + $0x18] sm:$0xff]  }
  0x37   :  { %363 = vmatprep.subr.bf16.mxu0 %v529_v0  ;;  %374 = vmatpush3.bf16.msra.mxu1 %v407_v4  ;;  %v412_v11 = vld [vmem:[#allocation9 + $0x10] sm:$0xff]   ;;  %v413_v17 = vld [vmem:[#allocation9 + $0x8] sm:$0xff]   ;;  %v414_v18 = vld [vmem:[#allocation9] sm:$0xff]   ;;  %v309_v40 = vsub.s32 %v306_v37, %v308_v38 }
  0x38   :  { %375 = vmatprep.subr.bf16.mxu1 %v529_v0  ;;  %v83_v12 = vld [vmem:[#allocation3] sm:$0xff] }
  0x39   :  { %v331_v19 = vld [vmem:[%s608_s3] ss:$0 sm:$0xff] }
  0x3a   :  { %364 = vmatpush3.bf16.msra.mxu0 %v404_v3  ;;  %v337_v27 = vld [vmem:[%s610_s5] ss:$0 sm:$0xff]  ;;  %s532_s5 = smov [#allocation11]  }
  0x3b   :  { %365 = vmatprep.subr.bf16.mxu0 %v529_v0  ;;  %376 = vmatpush3.bf16.msra.mxu1 %v408_v6  ;;  %v346_v31 = vld [vmem:[%s611_s6] ss:$0 sm:$0xff]  ;;  %s320_s9 = sshll.u32 %s532_s5, 4  ;;  %s321_s9 = int_to_ptr.vmem [resolvable:$true] %s320_s9 }
  0x3c   :  { %377 = vmatprep.subr.bf16.mxu1 %v529_v0  ;;  %s495_s6 = scalar_lea.vmem %s321_s9, 16  ;;  %s499_s10 = scalar_lea.vmem %s321_s9, 32 }
  0x3d   :  { %p496_p6 = scmp.ne.s32.totalorder %s321_s9, %s495_s6  ;;  %p500_p7 = scmp.lt.s32.totalorder %s321_s9, %s321_s9 }
  0x3e   :  { %366 = vmatpush3.bf16.msra.mxu0 %v405_v5  ;;  %p501_p8 = scmp.lt.s32.totalorder %s499_s10, %s495_s6 }
  0x3f   :  { %367 = vmatprep.subr.bf16.mxu0 %v529_v0  ;;  %378 = vmatpush3.bf16.msra.mxu1 %v409_v8 }
  0x40   :  { %379 = vmatprep.subr.bf16.mxu1 %v529_v0  ;;  %p502_p9 = por %p501_p8, %p500_p7 }
  0x42   :  { %368 = vmatpush3.bf16.msra.mxu0 %v406_v7  ;;  %p503_p10 = pnand %p502_p9, %p496_p6 }
  0x43   :  { %380 = vmatpush3.bf16.msra.mxu1 %v410_v9 }
  0x44   :  { %381 = vmatprep.subr.bf16.mxu1 %v529_v0 }
  0x47   :  { %382 = vmatpush3.bf16.msra.mxu1 %v411_v10 }
  0x48   :  { %383 = vmatprep.subr.bf16.mxu1 %v529_v0 }
  0x4b   :  { %384 = vmatpush3.bf16.msra.mxu1 %v412_v11 }
  0x4c   :  { %385 = vmatprep.subr.bf16.mxu1 %v529_v0 }
  0x4f   :  { %386 = vmatpush3.bf16.msra.mxu1 %v413_v17 }
  0x50   :  { %387 = vmatprep.subr.bf16.mxu1 %v529_v0 }
  0x53   :  { %388 = vmatpush3.bf16.msra.mxu1 %v414_v18 }
  0xa8   :  { %v87_v13 = vpop.permute.xlu0 %86 }
  0xa9   :  { %v90_v14 = vsel %vm89_vm1, %v83_v12, %v87_v13 }
  0xaa   :  { %v92_v15 = vsel %vm91_vm2, %v90_v14, 0.0 }
  0xab   :  { %v93_v16 = vpack.c.bf16 %v92_v15, %v92_v15 }
  0xad   :  { %370 = vmatmul.mubr.msk.bf16.vlgmr.msra.gmra.mxu0 %vm133_vm3, %v93_v16 }
 0x16d   :  { %v171_v20 = vpop.f32.mrf.mxu0 }
 0x16e   :  { %v172_v21 = vadd.f32 %v331_v19, %v171_v20 }
 0x16f   :  { %v371_v22 = vpop.f32.mrf.mxu0 }
 0x170   :  { %v177_v23 = vmax.f32 %v172_v21, 0.0 }
 0x171   :  { %v174_v24 = vpop.f32.mrf.mxu0 }
 0x172   :  { %v178_v25 = vpack.c.bf16 %v177_v23, %v177_v23 }
 0x173   :  { %v372_v26 = vpop.f32.mrf.mxu0 }
 0x174   :  { %390 = vmatmul.mubr.bf16.vlgmr.msra.gmra.mxu1 %v178_v25 }
 0x234   :  { %v284_v28 = vpop.f32.mrf.mxu1 }
 0x235   :  { %v285_v29 = vadd.f32 %v337_v27, %v284_v28 }
 0x236   :  { %v391_v30 = vpop.f32.mrf.mxu1 }
 0x237   :  { %v290_v32 = vmax.f32 %v285_v29, 0.0 }
 0x238   :  { %v287_v33 = vpop.f32.mrf.mxu1 }
 0x239   :  { %v298_v34 = vmul.f32 %v346_v31, %v290_v32 }
 0x23a   :  { %v392_v35 = vpop.f32.mrf.mxu1 }
 0x23b   :  { %299 = vadd.xlane.f32.xlu0 %v298_v34 }
 0x2c4   :  { %v300_v41 = vpop.xlane.xlu0 %299 }
 0x2c5   :  { %v303_v42 = vadd.f32 %v302_v39, %v300_v41 }
 0x2c7   :  { %v310_v43 = vrot.slane %v303_v42, %v309_v40 }
 0x2c9   :  { %313 = vst.msk [vmem:[#allocation11] sm:$0x1] %vm312_vm4, %v310_v43 }
 0x2ca   :  { %506 = shalt.err (!%p503_p10)
}
 0x2cb   :  { %323 = dma.vmem_to_hbm [thread:$0]  %s321_s9, 16, %s613_s8, [#allocation5]  }
 0x2cc   :  { %521 = dma.done.wait [#allocation5], 16  }
 0x2cd   :  { %522 = vsyncadd [#allocation5], 4294967280 }
 0x2ce   :  { %327 = vsyncpa [#allocation4], 1 }
 0x2cf   :  { %328 = vsyncpa [#allocation7], 1 }
 0x2d0   :  { %329 = vsyncpa [#allocation10], 1 }
 0x2d1   :  { %330 = vsyncpa [#allocation5], 1 }

</bundles_post_ra>
